<compile_context>
chip_gen: v7x
topology: tpu7x:2x2x1
jax: 0.10.0
libtpu: 0.0.40
codegen_flags: <defaults>
</compile_context>

<pallas_src>
import inspect
import math
from functools import partial

import numpy as np
import jax
import jax.numpy as jnp
from jax import lax
from jax.experimental import pallas as pl
from jax.experimental.pallas import tpu as pltpu

_BINOMIAL = {
    1: [1.0],
    2: [1.0, 1.0],
    3: [1.0, 2.0, 1.0],
    4: [1.0, 3.0, 3.0, 1.0],
    5: [1.0, 4.0, 6.0, 4.0, 1.0],
    6: [1.0, 5.0, 10.0, 10.0, 5.0, 1.0],
    7: [1.0, 6.0, 15.0, 20.0, 15.0, 6.0, 1.0],
}

try:
    _HAS_PIPELINE_MODE = (
        hasattr(pl, "Buffered")
        and "pipeline_mode" in inspect.signature(pl.BlockSpec).parameters
    )
except (TypeError, ValueError):  # pragma: no cover - exotic BlockSpec wrappers
    _HAS_PIPELINE_MODE = hasattr(pl, "Buffered")


def _out_size(size, ksize, stride, padding):
    return (size + 2 * padding - ksize) // stride + 1


def _blur_matrix(size_in, ksize, stride, padding):
    """(size_out, size_in): normalized 1-D binomial taps at the strided output
    positions, zero-padded at the borders."""
    a = np.asarray(_BINOMIAL[ksize], dtype=np.float64)
    a = a / a.sum()            # outer(a,a)/sum(outer) == outer(a/sum, a/sum)
    size_out = _out_size(size_in, ksize, stride, padding)
    m = np.zeros((size_out, size_in), dtype=np.float32)
    for o in range(size_out):
        base = stride * o - padding
        for t in range(ksize):
            i = base + t
            if 0 <= i < size_in:
                m[o, i] = a[t]
    return m


def _sublane_multiple(dtype):
    # f32 -> 8, bf16/f16 -> 16, int8/fp8 -> 32 (sub-32-bit dtypes pack sublanes).
    return max(8, 32 // max(1, jnp.dtype(dtype).itemsize))


def _choose_block_nc(nc, h, w, itemsize, sublane, target_bytes):
    """Pick (block_nc, nc_padded): ~1-2 MiB input tiles, divisor of NC when
    possible (no pad/slice HBM passes), sublane-aligned, even grid preferred."""
    row_bytes = h * w * itemsize                       # one channel-image
    if nc * row_bytes <= target_bytes:
        return nc, nc                                  # single full block: always legal
    candidates = [
        b for b in range(1, nc + 1)
        if nc % b == 0 and (b * h) % sublane == 0 and b * row_bytes <= target_bytes
    ]
    if candidates:
        best = max(candidates)
        # Mild preference for an even number of grid steps (v7x megacore balance)
        # when it does not shrink the tile by more than 2x.
        for b in sorted(candidates, reverse=True):
            if (nc // b) % 2 == 0:
                if 2 * b >= best:
                    best = b
                break
        return best, nc
    # Fallback: pad NC to a multiple of an aligned block size (extra HBM pass;
    # only hit when no divisor of N*C is sublane-compatible).
    base = sublane // math.gcd(h, sublane)             # smallest b with b*h % sublane == 0
    b = base
    while (b + base) * row_bytes <= target_bytes and (b + base) < nc:
        b += base
    nc_pad = ((nc + b - 1) // b) * b
    return b, nc_pad


def _resident_spec(block_shape, index_map, single_buffer):
    """BlockSpec for a grid-invariant operand (block index never changes):
    single-buffer it when supported -- default double-buffering only doubles its
    VMEM footprint for zero benefit."""
    if single_buffer and _HAS_PIPELINE_MODE:
        try:
            return pl.BlockSpec(block_shape, index_map,
                                pipeline_mode=pl.Buffered(buffer_count=1))
        except Exception:      # pragma: no cover - older/other JAX builds
            pass
    return pl.BlockSpec(block_shape, index_map)


# ----------------------------------------------------------------------------
# Pallas kernel
# ----------------------------------------------------------------------------
def _blurpool_kernel(x_ref, awt_ref, ahb_ref, o_ref):
    # x_ref  : (block_nc*H, W)          stacked channel-images
    # awt_ref: (W, W_out)               horizontal blur + stride taps (transposed)
    # ahb_ref: (block_nc, H_out, H)     vertical taps, broadcast over the batch
    # o_ref  : (block_nc, H_out, W_out)
    block_nc, h_out, w_out = o_ref.shape
    h = ahb_ref.shape[2]

    # Pass 1 (horizontal): dense 2-D MXU matmul over the whole stacked block.
    xh = jnp.dot(x_ref[...], awt_ref[...], preferred_element_type=jnp.float32)
    # Free view when H % 8 == 0 (typical CNN sizes); otherwise Mosaic inserts a
    # small relayout of this already 2x-reduced intermediate.
    xh = xh.reshape(block_nc, h, w_out)

    # Pass 2 (vertical): dense *batched* matmul -- replaces the old
    # kron(I_block_nc, A_h) block-diagonal matmul (no MXU work on zeros,
    # no block_nc^2-sized constant in VMEM).
    y = lax.dot_general(
        ahb_ref[...], xh,
        dimension_numbers=(((2,), (1,)), ((0,), (0,))),
        preferred_element_type=jnp.float32)
    o_ref[...] = y.astype(o_ref.dtype)               # one store per tile


# ----------------------------------------------------------------------------
# Wrapper: layout, constant blur matrices, grid/BlockSpecs
# ----------------------------------------------------------------------------
def blurpool_forward(x_nchw, *, kernel_size=3, stride=2, padding=1,
                     target_tile_bytes=2 * 1024 * 1024):
    n, c, h, w = x_nchw.shape
    dtype = x_nchw.dtype
    itemsize = jnp.dtype(dtype).itemsize
    h_out = _out_size(h, kernel_size, stride, padding)
    w_out = _out_size(w, kernel_size, stride, padding)
    nc = n * c

    block_nc, nc_pad = _choose_block_nc(
        nc, h, w, itemsize, _sublane_multiple(dtype), target_tile_bytes)
    num_blocks = nc_pad // block_nc

    # NCHW -> (NC, H, W) -> (NC*H, W): pure reshapes, no HBM transpose.
    x3 = x_nchw.reshape(nc, h, w)
    if nc_pad != nc:
        x3 = jnp.pad(x3, ((0, nc_pad - nc), (0, 0), (0, 0)))
    x2 = x3.reshape(nc_pad * h, w)

    a_h = _blur_matrix(h, kernel_size, stride, padding)        # (H_out, H)
    a_w = _blur_matrix(w, kernel_size, stride, padding)        # (W_out, W)
    awt = jnp.asarray(a_w.T, dtype=dtype)                      # (W, W_out)
    # Vertical taps pre-broadcast over the per-block batch so pass 2 is a dense
    # batched matmul.  Small: block_nc*H_out*H*4 bytes (<~1 MiB), DMA'd once.
    ahb = jnp.asarray(np.broadcast_to(a_h[None], (block_nc, h_out, h)).copy(),
                      dtype=jnp.float32)                       # (block_nc, H_out, H)

    # Advisory cost for XLA scheduling: both matmul passes + one read/write of
    # the activation/output plus the (tiny) constants.
    flops = 2 * nc_pad * w_out * h * (w + h_out)
    bytes_accessed = (nc_pad * h * w + nc_pad * h_out * w_out) * itemsize \
        + awt.size * itemsize + ahb.size * 4
    cost = pl.CostEstimate(flops=int(flops), transcendentals=0,
                           bytes_accessed=int(bytes_accessed))

    out3 = pl.pallas_call(
        _blurpool_kernel,
        grid=(num_blocks,),
        in_specs=[
            pl.BlockSpec((block_nc * h, w), lambda i: (i, 0)),
            _resident_spec((w, w_out), lambda i: (0, 0), num_blocks > 1),
            _resident_spec((block_nc, h_out, h), lambda i: (0, 0, 0), num_blocks > 1),
        ],
        out_specs=pl.BlockSpec((block_nc, h_out, w_out), lambda i: (i, 0, 0)),
        out_shape=jax.ShapeDtypeStruct((nc_pad, h_out, w_out), dtype),
        compiler_params=pltpu.CompilerParams(
            dimension_semantics=("parallel",),      # megacore-shardable grid
            vmem_limit_bytes=48 * 1024 * 1024,      # <= v7x 64 MiB/TC; ample for 2 MiB tiles
        ),
        cost_estimate=cost,
    )(x2, awt, ahb)

    out3 = out3[:nc] if nc_pad != nc else out3
    return out3.reshape(n, c, h_out, w_out)


# ----------------------------------------------------------------------------
# Pure-JAX reference (mirrors F.conv2d(..., groups=C) with the binomial kernel)
# ----------------------------------------------------------------------------
def ref_blurpool(x, kernel_size=3, stride=2, padding=1):
    a = jnp.asarray(_BINOMIAL[kernel_size], jnp.float32)
    k2 = jnp.outer(a, a)
    k2 = k2 / jnp.sum(k2)
    c = x.shape[1]
    wgt = jnp.broadcast_to(k2, (c, 1, kernel_size, kernel_size))
    return lax.conv_general_dilated(
        x.astype(jnp.float32), wgt, window_strides=(stride, stride),
        padding=((padding, padding), (padding, padding)),
        dimension_numbers=("NCHW", "OIHW", "NCHW"),
        feature_group_count=c)


# ----------------------------------------------------------------------------
if __name__ == "__main__":
    n, c, h, w = 2, 4, 16, 16
    key = jax.random.PRNGKey(0)
    x = jax.random.normal(key, (n, c, h, w), jnp.float32)

    h_out = _out_size(h, 3, 2, 1)
    w_out = _out_size(w, 3, 2, 1)
    ref = ref_blurpool(x, 3, 2, 1)

    # f32 path: the blur taps are exact -> tight tolerance.
    fwd = jax.jit(partial(blurpool_forward, kernel_size=3, stride=2, padding=1))
    out = jax.block_until_ready(fwd(x))
    assert out.shape == (n, c, h_out, w_out), out.shape
    assert out.dtype == x.dtype, out.dtype
    err = float(jnp.max(jnp.abs(out - ref)))
    assert err < 1e-5, f"f32 max abs err too large: {err}"

    # bf16 activations: the HBM-traffic lever from the perf review (only input /
    # output quantization error is introduced -> loosened tolerance).
    out_bf16 = jax.block_until_ready(jax.jit(blurpool_forward)(x.astype(jnp.bfloat16)))
    assert out_bf16.shape == (n, c, h_out, w_out), out_bf16.shape
    assert out_bf16.dtype == jnp.bfloat16, out_bf16.dtype
    err_bf16 = float(jnp.max(jnp.abs(out_bf16.astype(jnp.float32) - ref)))
    assert err_bf16 < 5e-2, f"bf16 max abs err too large: {err_bf16}"

    print("KERNEL_OK")
</pallas_src>

<mosaic_0001>
module attributes {stable_mosaic.version = 11 : i64} {
  func.func @_blurpool_kernel(%arg0: i32, %arg1: memref<128x16xf32, #tpu.memory_space<vmem>>, %arg2: memref<16x8xf32, #tpu.memory_space<vmem>>, %arg3: memref<8x8x16xf32, #tpu.memory_space<vmem>>, %arg4: memref<8x8x8xf32, #tpu.memory_space<vmem>>) attributes {dimension_semantics = [#tpu.dimension_semantics<parallel>], iteration_bounds = array<i64: 1>, scalar_prefetch = 0 : i64, scratch_operands = 0 : i64, tpu.core_type = #tpu.core_type<tc>, window_params = [{transform_indices = @transform_0, window_bounds = array<i64: 128, 16>}, {pipeline_mode = #tpu.pipeline_mode<synchronous>, transform_indices = @transform_1, window_bounds = array<i64: 16, 8>}, {pipeline_mode = #tpu.pipeline_mode<synchronous>, transform_indices = @transform_2, window_bounds = array<i64: 8, 8, 16>}, {transform_indices = @transform_3, window_bounds = array<i64: 8, 8, 8>}]} {
    %c0 = arith.constant 0 : index
    %c0_0 = arith.constant 0 : index
    %0 = vector.load %arg1[%c0, %c0_0] : memref<128x16xf32, #tpu.memory_space<vmem>>, vector<128x16xf32>
    %c0_1 = arith.constant 0 : index
    %c0_2 = arith.constant 0 : index
    %1 = vector.load %arg2[%c0_1, %c0_2] : memref<16x8xf32, #tpu.memory_space<vmem>>, vector<16x8xf32>
    %cst = arith.constant dense<0.000000e+00> : vector<128x8xf32>
    %2 = tpu.matmul %0, %1, %cst {dimension_numbers = #tpu.dot_dimension_numbers<[1], [0], [0], [1], [0, 0, 1, 1], [], []>} : vector<128x16xf32>, vector<16x8xf32>, vector<128x8xf32> -> vector<128x8xf32>
    %3 = vector.shape_cast %2 : vector<128x8xf32> to vector<8x16x8xf32>
    %c0_3 = arith.constant 0 : index
    %c0_4 = arith.constant 0 : index
    %c0_5 = arith.constant 0 : index
    %4 = vector.load %arg3[%c0_3, %c0_4, %c0_5] : memref<8x8x16xf32, #tpu.memory_space<vmem>>, vector<8x8x16xf32>
    %cst_6 = arith.constant dense<0.000000e+00> : vector<8x8x8xf32>
    %5 = tpu.matmul %4, %3, %cst_6 {dimension_numbers = #tpu.dot_dimension_numbers<[2], [1], [1], [2], [0, 0, 0, 1, 1, 2], [0], [0]>} : vector<8x8x16xf32>, vector<8x16x8xf32>, vector<8x8x8xf32> -> vector<8x8x8xf32>
    %c0_7 = arith.constant 0 : index
    %c0_8 = arith.constant 0 : index
    %c0_9 = arith.constant 0 : index
    %6 = vector.load %arg4[%c0_7, %c0_8, %c0_9] : memref<8x8x8xf32, #tpu.memory_space<vmem>>, vector<8x8x8xf32>
    tpu.vector_store %arg4[%c0_7, %c0_8, %c0_9], %5 {strides = array<i32>} : memref<8x8x8xf32, #tpu.memory_space<vmem>>, vector<8x8x8xf32>,
    return
  }
  func.func @transform_0(%arg0: i32) -> (i32, i32) {
    %c0_i32 = arith.constant 0 : i32
    %c0_i32_0 = arith.constant 0 : i32
    return %arg0, %c0_i32 : i32, i32
  }
  func.func @transform_1(%arg0: i32) -> (i32, i32) {
    %c0_i32 = arith.constant 0 : i32
    %c0_i32_0 = arith.constant 0 : i32
    %c0_i32_1 = arith.constant 0 : i32
    return %c0_i32, %c0_i32_0 : i32, i32
  }
  func.func @transform_2(%arg0: i32) -> (i32, i32, i32) {
    %c0_i32 = arith.constant 0 : i32
    %c0_i32_0 = arith.constant 0 : i32
    %c0_i32_1 = arith.constant 0 : i32
    %c0_i32_2 = arith.constant 0 : i32
    return %c0_i32, %c0_i32_0, %c0_i32_1 : i32, i32, i32
  }
  func.func @transform_3(%arg0: i32) -> (i32, i32, i32) {
    %c0_i32 = arith.constant 0 : i32
    %c0_i32_0 = arith.constant 0 : i32
    %c0_i32_1 = arith.constant 0 : i32
    return %arg0, %c0_i32, %c0_i32_0 : i32, i32, i32
  }
}

</mosaic_0001>

<bundles_post_ra>
// kernel: blurpool_forward.1
= control target key start
LH: loop header
LB: loop body
LE: loop exit
PB: predicated region body
PF: predicated region fallthrough
CT: control target
= control target key end

     0   :  { %8 = vsyncpa [#allocation3], 0  ;;  %s1304_s0 = inlined_call_operand.hbm [shape: f32[128,16], index: 0, kind: input, shape index: {}]   ;;  %s1305_s1 = inlined_call_operand.hbm [shape: f32[16,8], index: 1, kind: input, shape index: {}]   ;;  %s1306_s2 = inlined_call_operand.hbm [shape: f32[8,8,16], index: 2, kind: input, shape index: {}]   ;;  %s1307_s3 = inlined_call_operand.hbm [shape: f32[8,8,8], index: 3, kind: output, shape index: {}]  }
   0x1   :  { %9 = vsyncpa [#allocation6], 0 }
   0x2   :  { %10 = vsyncpa [#allocation4], 0  ;;  %s1168_s12 = smov [#allocation5]   ;;  %s1169_s14 = smov [#allocation2]  }
   0x3   :  { %s28_s13 = sshll.u32 %s1168_s12, 4  ;;  %s16_s15 = sshll.u32 %s1169_s14, 4  ;;  %s29_s13 = int_to_ptr.vmem [resolvable:$true] %s28_s13  ;;  %s1197_s15 = int_to_ptr.vmem [resolvable:$true] %s16_s15 }
   0x4   :  { %s1074_s18 = scalar_lea.hbm %s1305_s1, 256 }
   0x5   :  { %p1075_p0 = scmp.ne.s32.totalorder %s1305_s1, %s1074_s18  ;;  %p1078_p1 = scmp.lt.u32.totalorder %s1074_s18, %s1305_s1 }
   0x7   :  { %p1080_p2 = pnand %p1078_p1, %p1075_p0 }
   0x9   :  { %1083 = shalt.err (!%p1080_p2)
}
   0xa   :  { %s1084_s23 = scalar_lea.vmem %s29_s13, 256  ;;  %p1089_p4 = scmp.lt.s32.totalorder %s29_s13, %s29_s13 }
   0xb   :  { %p1085_p3 = scmp.ne.s32.totalorder %s29_s13, %s1084_s23  ;;  %p1090_p5 = scmp.lt.s32.totalorder %s1084_s23, %s1084_s23 }
   0xd   :  { %p1091_p6 = por %p1090_p5, %p1089_p4 }
   0xf   :  { %p1092_p7 = pnand %p1091_p6, %p1085_p3 }
  0x11   :  { %1095 = shalt.err (!%p1092_p7)
}
  0x12   :  { %s1170_s24 = smov 128   ;;  %s1171_s25 = smov 8  }
  0x13   :  { %34 = dma.hbm_to_vmem [thread:$0]  %s1305_s1, 256, %s29_s13, [#allocation6], %s1170_s24, %s1170_s24, %s1171_s25  }
  0x14   :  { %s1096_s30 = scalar_lea.hbm %s1304_s0, 2048 }
  0x15   :  { %p1097_p8 = scmp.ne.s32.totalorder %s1304_s0, %s1096_s30  ;;  %p1100_p9 = scmp.lt.u32.totalorder %s1096_s30, %s1304_s0 }
  0x17   :  { %p1102_p10 = pnand %p1100_p9, %p1097_p8 }
  0x19   :  { %1105 = shalt.err (!%p1102_p10)
}
  0x1a   :  { %s1106_s8 = scalar_lea.vmem %s1197_s15, 2048  ;;  %p1111_p12 = scmp.lt.s32.totalorder %s1197_s15, %s1197_s15 }
  0x1b   :  { %p1107_p11 = scmp.ne.s32.totalorder %s1197_s15, %s1106_s8  ;;  %p1112_p13 = scmp.lt.s32.totalorder %s1106_s8, %s1106_s8 }
  0x1d   :  { %p1113_p0 = por %p1112_p13, %p1111_p12 }
  0x1f   :  { %p1114_p1 = pnand %p1113_p0, %p1107_p11 }
  0x21   :  { %1117 = shalt.err (!%p1114_p1)
}
  0x22   :  { %22 = dma.hbm_to_vmem [thread:$0]  %s1304_s0, 2048, %s1197_s15, [#allocation3], %s1170_s24, %s1170_s24, %s1171_s25  }
  0x23   :  { %s1172_s10 = smov [#allocation7]   ;;  %s1118_s14 = scalar_lea.hbm %s1306_s2, 1024 }
  0x24   :  { %s40_s11 = sshll.u32 %s1172_s10, 4  ;;  %p1119_p2 = scmp.ne.s32.totalorder %s1306_s2, %s1118_s14  ;;  %s41_s11 = int_to_ptr.vmem [resolvable:$true] %s40_s11 }
  0x25   :  { %p1122_p3 = scmp.lt.u32.totalorder %s1118_s14, %s1306_s2 }
  0x27   :  { %p1124_p4 = pnand %p1122_p3, %p1119_p2 }
  0x29   :  { %1127 = shalt.err (!%p1124_p4)
}
  0x2a   :  { %s1128_s20 = scalar_lea.vmem %s41_s11, 1024  ;;  %p1133_p6 = scmp.lt.s32.totalorder %s41_s11, %s41_s11 }
  0x2b   :  { %p1129_p5 = scmp.ne.s32.totalorder %s41_s11, %s1128_s20  ;;  %p1134_p7 = scmp.lt.s32.totalorder %s1128_s20, %s1128_s20 }
  0x2d   :  { %p1135_p8 = por %p1134_p7, %p1133_p6 }
  0x2f   :  { %p1136_p9 = pnand %p1135_p8, %p1129_p5 }
  0x31   :  { %1139 = shalt.err (!%p1136_p9)
}
  0x32   :  { %46 = dma.hbm_to_vmem [thread:$0]  %s1306_s2, 1024, %s41_s11, [#allocation6], %s1170_s24, %s1170_s24, %s1171_s25  }
  0x33   :  { %1162 = dma.done.wait [#allocation3], 2048  }
  0x34   :  { %1163 = vsyncadd [#allocation3], 4294965248 }
  0x35   :  { %1164 = dma.done.wait [#allocation6], 1280  }
  0x36   :  { %1165 = vsyncadd [#allocation6], 4294966016  ;;  %vm74_vm0 = vcmask 130048   ;;  %v72_v0 = vld [vmem:[#allocation5] sm:$0xff]  ;;  %v73_v1 = vld [vmem:[#allocation5 + $0x8] sm:$0xff]  ;;  %v1173_v19 = vmov 0.0|0.0  }
  0x37   :  { %v56_v2 = vld [vmem:[#allocation2] sm:$0xff]  ;;  %v1037_v3 = vpack.c.bf16 %v73_v1, %v72_v0  ;;  %v57_v4 = vld [vmem:[#allocation2 + $0x8] sm:$0xff]  ;;  %v58_v5 = vld [vmem:[#allocation2 + $0x10] sm:$0xff]  ;;  %1041 = vmatprep.subr.bf16.mxu1 %v1173_v19  ;;  %vm1174_vm1 = vmmov 0   ;;  %v1175_v20 = vmov 0.0   ;;  %vm860_vm2 = vcmask 64512  }
  0x38   :  { %957 = vmatprep.mubr.msk.f32.mxu0 %vm74_vm0, %v56_v2  ;;  %v59_v6 = vld [vmem:[#allocation2 + $0x18] sm:$0xff]  ;;  %v60_v7 = vld [vmem:[#allocation2 + $0x20] sm:$0xff]  ;;  %v61_v8 = vld [vmem:[#allocation2 + $0x28] sm:$0xff]  ;;  %985 = vmatprep.mubr.msk.f32.mxu1 %vm1174_vm1, %v1175_v20  ;;  %s1176_s2 = smov [#allocation8]  }
  0x39   :  { %1038 = vmatprep.subr.bf16.mxu0 %v1037_v3  ;;  %v62_v9 = vld [vmem:[#allocation2 + $0x30] sm:$0xff]  ;;  %v63_v10 = vld [vmem:[#allocation2 + $0x38] sm:$0xff]  ;;  %v64_v11 = vld [vmem:[#allocation2 + $0x40] sm:$0xff]  ;;  %s874_s21 = sshll.u32 %s1176_s2, 4  ;;  %s875_s21 = int_to_ptr.vmem [resolvable:$true] %s874_s21 }
  0x3a   :  { %1040 = vmatpush3.bf16.msra.mxu0 %v1037_v3  ;;  %v65_v12 = vld [vmem:[#allocation2 + $0x48] sm:$0xff]  ;;  %v66_v13 = vld [vmem:[#allocation2 + $0x50] sm:$0xff]  ;;  %v67_v14 = vld [vmem:[#allocation2 + $0x58] sm:$0xff]  ;;  %s1140_s22 = scalar_lea.vmem %s875_s21, 1024  ;;  %p1145_p11 = scmp.lt.s32.totalorder %s875_s21, %s875_s21 }
  0x3b   :  { %v68_v15 = vld [vmem:[#allocation2 + $0x60] sm:$0xff]  ;;  %v69_v16 = vld [vmem:[#allocation2 + $0x68] sm:$0xff]  ;;  %v70_v17 = vld [vmem:[#allocation2 + $0x70] sm:$0xff]  ;;  %p1141_p10 = scmp.ne.s32.totalorder %s875_s21, %s1140_s22  ;;  %p1146_p12 = scmp.lt.s32.totalorder %s1140_s22, %s1140_s22 }
  0x3c   :  { %v71_v18 = vld [vmem:[#allocation2 + $0x78] sm:$0xff]  ;;  %v268_v25 = vld [vmem:[#allocation7] sm:$0xff]  ;;  %v270_v33 = vld [vmem:[#allocation7 + $0x10] sm:$0xff] }
  0x3d   :  { %958 = vmatmul.mubr.msk.f32.vlgmr.msra.gmra.mrb[0].mxu0 %vm74_vm0, %v57_v4  ;;  %v269_v29 = vld [vmem:[#allocation7 + $0x8] sm:$0xff]  ;;  %v271_v37 = vld [vmem:[#allocation7 + $0x18] sm:$0xff]  ;;  %v272_v41 = vld [vmem:[#allocation7 + $0x20] sm:$0xff]  ;;  %p1147_p13 = por %p1146_p12, %p1145_p11 }
  0x3e   :  { %960 = vmatprep.mubr.msk.f32.mxu0 %vm74_vm0, %v58_v5  ;;  %v273_v45 = vld [vmem:[#allocation7 + $0x28] sm:$0xff]  ;;  %v274_v49 = vld [vmem:[#allocation7 + $0x30] sm:$0xff]  ;;  %v275_v52 = vld [vmem:[#allocation7 + $0x38] sm:$0xff] }
  0x3f   :  { %p1148_p0 = pnand %p1147_p13, %p1141_p10 }
  0x41   :  { %961 = vmatmul.mubr.msk.f32.gmra.mrb[2].mxu0 %vm74_vm0, %v59_v6 }
  0x42   :  { %963 = vmatprep.mubr.msk.f32.mxu0 %vm74_vm0, %v60_v7 }
  0x45   :  { %964 = vmatmul.mubr.msk.f32.gmra.mrb[4].mxu0 %vm74_vm0, %v61_v8 }
  0x46   :  { %966 = vmatprep.mubr.msk.f32.mxu0 %vm74_vm0, %v62_v9 }
  0x49   :  { %967 = vmatmul.mubr.msk.f32.gmra.mrb[6].mxu0 %vm74_vm0, %v63_v10 }
  0x4a   :  { %969 = vmatprep.mubr.msk.f32.mxu0 %vm74_vm0, %v64_v11 }
  0x4d   :  { %970 = vmatmul.mubr.msk.f32.gmra.mrb[8].mxu0 %vm74_vm0, %v65_v12 }
  0x4e   :  { %972 = vmatprep.mubr.msk.f32.mxu0 %vm74_vm0, %v66_v13 }
  0x51   :  { %973 = vmatmul.mubr.msk.f32.gmra.mrb[10].mxu0 %vm74_vm0, %v67_v14 }
  0x52   :  { %975 = vmatprep.mubr.msk.f32.mxu0 %vm74_vm0, %v68_v15 }
  0x55   :  { %976 = vmatmul.mubr.msk.f32.gmra.mrb[12].mxu0 %vm74_vm0, %v69_v16 }
  0x56   :  { %978 = vmatprep.mubr.msk.f32.mxu0 %vm74_vm0, %v70_v17 }
  0x59   :  { %979 = vmatmul.mubr.msk.f32.gmra.mrb[14].mxu0 %vm74_vm0, %v71_v18 }
 0x110   :  { %v959_v21 = vpop.f32.mrb[0].mxu0 }
 0x111   :  { %v189_v22 = vpop.f32.mrb[1].mxu0 }
 0x112   :  { %v1042_v23 = vpack.c.bf16 %v959_v21, %v189_v22 }
 0x114   :  { %v962_v24 = vpop.f32.mrb[2].mxu0  ;;  %1043 = vmatpush3.bf16.msra.mxu1 %v1042_v23 }
 0x115   :  { %v199_v26 = vpop.f32.mrb[3].mxu0  ;;  %1044 = vmatprep.subr.bf16.mxu1 %v1173_v19 }
 0x116   :  { %v1045_v27 = vpack.c.bf16 %v962_v24, %v199_v26 }
 0x117   :  { %986 = vmatmul.mubr.msk.f32.vlgmr.msra.gmra.mrb[0].mxu1 %vm74_vm0, %v268_v25 }
 0x118   :  { %v965_v28 = vpop.f32.mrb[4].mxu0  ;;  %1046 = vmatpush3.bf16.msra.mxu1 %v1045_v27  ;;  %992 = vmatprep.mubr.msk.f32.mxu1 %vm1174_vm1, %v1175_v20 }
 0x119   :  { %v209_v30 = vpop.f32.mrb[5].mxu0  ;;  %1047 = vmatprep.subr.bf16.mxu1 %v1173_v19 }
 0x11a   :  { %v1048_v31 = vpack.c.bf16 %v965_v28, %v209_v30 }
 0x11b   :  { %993 = vmatmul.mubr.msk.f32.vlgmr.msra.gmra.mrb[2].mxu1 %vm74_vm0, %v269_v29 }
 0x11c   :  { %v968_v32 = vpop.f32.mrb[6].mxu0  ;;  %1049 = vmatpush3.bf16.msra.mxu1 %v1048_v31  ;;  %999 = vmatprep.mubr.msk.f32.mxu1 %vm1174_vm1, %v1175_v20 }
 0x11d   :  { %v219_v34 = vpop.f32.mrb[7].mxu0  ;;  %1050 = vmatprep.subr.bf16.mxu1 %v1173_v19 }
 0x11e   :  { %v1051_v35 = vpack.c.bf16 %v968_v32, %v219_v34 }
 0x11f   :  { %1000 = vmatmul.mubr.msk.f32.vlgmr.msra.gmra.mrb[4].mxu1 %vm74_vm0, %v270_v33 }
 0x120   :  { %v971_v36 = vpop.f32.mrb[8].mxu0  ;;  %1052 = vmatpush3.bf16.msra.mxu1 %v1051_v35  ;;  %1006 = vmatprep.mubr.msk.f32.mxu1 %vm1174_vm1, %v1175_v20 }
 0x121   :  { %v229_v38 = vpop.f32.mrb[9].mxu0  ;;  %1053 = vmatprep.subr.bf16.mxu1 %v1173_v19 }
 0x122   :  { %v1054_v39 = vpack.c.bf16 %v971_v36, %v229_v38 }
 0x123   :  { %1007 = vmatmul.mubr.msk.f32.vlgmr.msra.gmra.mrb[6].mxu1 %vm74_vm0, %v271_v37 }
 0x124   :  { %v974_v40 = vpop.f32.mrb[10].mxu0  ;;  %1055 = vmatpush3.bf16.msra.mxu1 %v1054_v39  ;;  %1013 = vmatprep.mubr.msk.f32.mxu1 %vm1174_vm1, %v1175_v20 }
 0x125   :  { %v239_v42 = vpop.f32.mrb[11].mxu0  ;;  %1056 = vmatprep.subr.bf16.mxu1 %v1173_v19 }
 0x126   :  { %v1057_v43 = vpack.c.bf16 %v974_v40, %v239_v42 }
 0x127   :  { %1014 = vmatmul.mubr.msk.f32.vlgmr.msra.gmra.mrb[8].mxu1 %vm74_vm0, %v272_v41 }
 0x128   :  { %v977_v44 = vpop.f32.mrb[12].mxu0  ;;  %1058 = vmatpush3.bf16.msra.mxu1 %v1057_v43  ;;  %1020 = vmatprep.mubr.msk.f32.mxu1 %vm1174_vm1, %v1175_v20 }
 0x129   :  { %v249_v46 = vpop.f32.mrb[13].mxu0  ;;  %1059 = vmatprep.subr.bf16.mxu1 %v1173_v19 }
 0x12a   :  { %v1060_v47 = vpack.c.bf16 %v977_v44, %v249_v46 }
 0x12b   :  { %1021 = vmatmul.mubr.msk.f32.vlgmr.msra.gmra.mrb[10].mxu1 %vm74_vm0, %v273_v45 }
 0x12c   :  { %v980_v48 = vpop.f32.mrb[14].mxu0  ;;  %1061 = vmatpush3.bf16.msra.mxu1 %v1060_v47  ;;  %1027 = vmatprep.mubr.msk.f32.mxu1 %vm1174_vm1, %v1175_v20 }
 0x12d   :  { %v259_v50 = vpop.f32.mrb[15].mxu0  ;;  %1062 = vmatprep.subr.bf16.mxu1 %v1173_v19 }
 0x12e   :  { %v1063_v51 = vpack.c.bf16 %v980_v48, %v259_v50 }
 0x12f   :  { %1028 = vmatmul.mubr.msk.f32.vlgmr.msra.gmra.mrb[12].mxu1 %vm74_vm0, %v274_v49 }
 0x130   :  { %1064 = vmatpush3.bf16.msra.mxu1 %v1063_v51  ;;  %1034 = vmatprep.mubr.msk.f32.mxu1 %vm1174_vm1, %v1175_v20 }
 0x133   :  { %1035 = vmatmul.mubr.msk.f32.vlgmr.msra.gmra.mrb[14].mxu1 %vm74_vm0, %v275_v52 }
 0x1ea   :  { %v345_v53 = vpop.f32.mrb[0].mxu1 }
 0x1eb   :  { %861 = vst.msk [vmem:[#allocation8] sm:$0xff] %vm860_vm2, %v345_v53  ;;  %v987_v54 = vpop.f32.mrb[1].mxu1 }
 0x1ee   :  { %v418_v55 = vpop.f32.mrb[2].mxu1 }
 0x1ef   :  { %862 = vst.msk [vmem:[#allocation8 + $0x8] sm:$0xff] %vm860_vm2, %v418_v55  ;;  %v994_v56 = vpop.f32.mrb[3].mxu1 }
 0x1f2   :  { %v491_v57 = vpop.f32.mrb[4].mxu1 }
 0x1f3   :  { %863 = vst.msk [vmem:[#allocation8 + $0x10] sm:$0xff] %vm860_vm2, %v491_v57  ;;  %v1001_v58 = vpop.f32.mrb[5].mxu1 }
 0x1f6   :  { %v564_v59 = vpop.f32.mrb[6].mxu1 }
 0x1f7   :  { %864 = vst.msk [vmem:[#allocation8 + $0x18] sm:$0xff] %vm860_vm2, %v564_v59  ;;  %v1008_v60 = vpop.f32.mrb[7].mxu1 }
 0x1fa   :  { %v637_v61 = vpop.f32.mrb[8].mxu1 }
 0x1fb   :  { %865 = vst.msk [vmem:[#allocation8 + $0x20] sm:$0xff] %vm860_vm2, %v637_v61  ;;  %v1015_v62 = vpop.f32.mrb[9].mxu1 }
 0x1fe   :  { %v710_v63 = vpop.f32.mrb[10].mxu1 }
 0x1ff   :  { %866 = vst.msk [vmem:[#allocation8 + $0x28] sm:$0xff] %vm860_vm2, %v710_v63  ;;  %v1022_v0 = vpop.f32.mrb[11].mxu1 }
 0x202   :  { %v783_v1 = vpop.f32.mrb[12].mxu1 }
 0x203   :  { %867 = vst.msk [vmem:[#allocation8 + $0x30] sm:$0xff] %vm860_vm2, %v783_v1  ;;  %v1029_v2 = vpop.f32.mrb[13].mxu1 }
 0x206   :  { %v856_v3 = vpop.f32.mrb[14].mxu1 }
 0x207   :  { %868 = vst.msk [vmem:[#allocation8 + $0x38] sm:$0xff] %vm860_vm2, %v856_v3  ;;  %v1036_v4 = vpop.f32.mrb[15].mxu1 }
 0x208   :  { %1151 = shalt.err (!%p1148_p0)
}
 0x209   :  { %s1152_s27 = scalar_lea.hbm %s1307_s3, 1024 }
 0x20a   :  { %p1153_p1 = scmp.ne.s32.totalorder %s1307_s3, %s1152_s27  ;;  %p1156_p2 = scmp.lt.u32.totalorder %s1152_s27, %s1307_s3 }
 0x20c   :  { %p1158_p3 = pnand %p1156_p2, %p1153_p1 }
 0x20e   :  { %1161 = shalt.err (!%p1158_p3)
}
 0x20f   :  { %880 = dma.vmem_to_hbm [thread:$0]  %s875_s21, 1024, %s1307_s3, [#allocation4], %s1170_s24, %s1170_s24, %s1171_s25  }
 0x210   :  { %1166 = dma.done.wait [#allocation4], 1024  }
 0x211   :  { %1167 = vsyncadd [#allocation4], 4294966272 }
 0x212   :  { %884 = vsyncpa [#allocation3], 1 }
 0x213   :  { %885 = vsyncpa [#allocation6], 1 }
 0x214   :  { %886 = vsyncpa [#allocation4], 1 }

</bundles_post_ra>
